<compile_context>
chip_gen: v5e
topology: v5e:2x2
jax: 0.10.0
libtpu: 0.0.40
codegen_flags: <defaults>
</compile_context>

<pallas_src>
import math

import jax
import jax.numpy as jnp
from jax.experimental import pallas as pl
from jax.experimental.pallas import tpu as pltpu

LANE = 128
SUBLANE = 8


def _round_up(x, m):
    return ((x + m - 1) // m) * m


def _choose_tile(batch, tile_b):
    """Pick (batch_tile, padded_batch).

    - pad batch to the 8-row sublane granularity,
    - aim for >= 2 grid steps (keeps both TensorCores busy on v7x),
    - cap the tile at tile_b (default 1024; 1024-2048 is the sweet spot:
      per-step pipeline overhead ~0.35us dominates this tiny MLP body).
    """
    bp8 = _round_up(max(batch, 1), SUBLANE)
    if bp8 <= 2 * SUBLANE:
        return bp8, bp8
    tb = min(tile_b, _round_up(pl.cdiv(bp8, 2), SUBLANE))
    return tb, _round_up(bp8, tb)


def critic_kernel(s_ref, a_ref, w1s_ref, w1a_ref, b1_ref,
                  w2_ref, b2_ref, w3_ref, b3_ref, out_ref):
    """Fused critic MLP over one batch tile (concat fused into fc1)."""
    # fc1: bf16 MXU matmul for the state half, f32 accumulation.
    h1 = jnp.dot(s_ref[...], w1s_ref[...], preferred_element_type=jnp.float32)

    # Action half: action_size is tiny -> unrolled VPU broadcast FMAs in f32
    # (no extra MXU push, no precision loss). Falls back to bf16 MXU if wide.
    a_cols = a_ref.shape[1]
    if a_cols <= 8:
        a = a_ref[...]          # (tb, A)  f32
        w1a = w1a_ref[...]      # (A, F1p) f32
        for j in range(a_cols):
            h1 = h1 + a[:, j:j + 1] * w1a[j:j + 1, :]
    else:
        h1 = h1 + jnp.dot(a_ref[...].astype(jnp.bfloat16),
                          w1a_ref[...].astype(jnp.bfloat16),
                          preferred_element_type=jnp.float32)
    h1 = jnp.maximum(h1 + b1_ref[...], 0.0)

    # fc2: bf16 MXU, f32 accumulation.
    h2 = jnp.dot(h1.astype(jnp.bfloat16), w2_ref[...],
                 preferred_element_type=jnp.float32) + b2_ref[...]
    h2 = jnp.maximum(h2, 0.0)

    # fc3 (fc2 -> 1): f32 VPU multiply + lane reduce (w3 stored as a row),
    # avoiding an N=1 MXU pass and keeping the tiny Q-values in f32.
    q = jnp.sum(h2 * w3_ref[...], axis=-1, keepdims=True) + b3_ref[...]
    out_ref[...] = q.astype(out_ref.dtype)


def critic_forward(states, actions, kernel_params, *, tile_b=1024):
    """Batched critic forward. Returns (B, 1) f32 Q-values."""
    w1s, w1a, b1, w2, b2, w3, b3 = kernel_params
    B, S = states.shape
    A = actions.shape[1]

    tb, Bp = _choose_tile(B, tile_b)
    if Bp != B:
        pad = ((0, Bp - B), (0, 0))
        states = jnp.pad(states, pad)
        actions = jnp.pad(actions, pad)

    # MXU operand in bf16 (halves input HBM read); actions stay f32 (VPU path).
    states = states.astype(jnp.bfloat16)

    grid = (Bp // tb,)

    def row_spec(cols):
        return pl.BlockSpec((tb, cols), lambda i: (i, 0))

    def full_spec(arr):
        # Full-extent block, same block index every step -> VMEM-resident.
        return pl.BlockSpec(arr.shape, lambda i: (0, 0))

    out = pl.pallas_call(
        critic_kernel,
        out_shape=jax.ShapeDtypeStruct((Bp, 1), jnp.float32),
        grid=grid,
        in_specs=[row_spec(S), row_spec(A),
                  full_spec(w1s), full_spec(w1a), full_spec(b1),
                  full_spec(w2), full_spec(b2),
                  full_spec(w3), full_spec(b3)],
        out_specs=pl.BlockSpec((tb, 1), lambda i: (i, 0)),
        compiler_params=pltpu.CompilerParams(
            dimension_semantics=("parallel",)),
    )(states, actions, w1s, w1a, b1, w2, b2, w3, b3)

    return out if Bp == B else out[:B]


def init_critic_params(key, state_size, action_size, fc1, fc2):
    """Deterministic init mirroring the PyTorch module.

    Note: the reference `hidden_init` uses weight.size()[0] == out_features as
    its fan-in (as written in the original code), so lim = 1/sqrt(out_features)
    for fc1/fc2 weights. Biases keep the default nn.Linear init
    (uniform +-1/sqrt(in_features)).
    """
    ks = jax.random.split(key, 6)
    in1 = state_size + action_size

    lim1 = 1.0 / math.sqrt(fc1)   # hidden_init(fc1): weight.size(0) = fc1
    lim2 = 1.0 / math.sqrt(fc2)   # hidden_init(fc2): weight.size(0) = fc2
    lim3 = 0.003

    blim1 = 1.0 / math.sqrt(in1)
    blim2 = 1.0 / math.sqrt(fc1)
    blim3 = 1.0 / math.sqrt(fc2)

    # Stored as (in, out) so the kernel computes x @ W.
    w1 = jax.random.uniform(ks[0], (in1, fc1), jnp.float32, -lim1, lim1)
    b1 = jax.random.uniform(ks[1], (1, fc1), jnp.float32, -blim1, blim1)
    w2 = jax.random.uniform(ks[2], (fc1, fc2), jnp.float32, -lim2, lim2)
    b2 = jax.random.uniform(ks[3], (1, fc2), jnp.float32, -blim2, blim2)
    w3 = jax.random.uniform(ks[4], (fc2, 1), jnp.float32, -lim3, lim3)
    b3 = jax.random.uniform(ks[5], (1, 1), jnp.float32, -blim3, blim3)
    return (w1, b1, w2, b2, w3, b3)


def prepare_kernel_params(params, state_size, action_size):
    """One-time conversion to the kernel layout.

    - Splits W1 into state / action halves (fuses the concat into the kernel).
    - Zero-pads fc1 / fc2 to multiples of 128 lanes (exact: padded rows/cols
      are zero, relu(0) = 0, so they contribute nothing downstream).
    - Stores MXU operands (W1_state, W2) in bf16; tiny VPU-path operands
      (W1_action, biases, W3 row) stay f32.
    """
    w1, b1, w2, b2, w3, b3 = params
    fc1 = w1.shape[1]
    fc2 = w2.shape[1]
    f1p = _round_up(fc1, LANE)
    f2p = _round_up(fc2, LANE)

    w1s = jnp.zeros((state_size, f1p), jnp.float32).at[:, :fc1].set(w1[:state_size])
    w1a = jnp.zeros((action_size, f1p), jnp.float32).at[:, :fc1].set(w1[state_size:])
    b1p = jnp.zeros((1, f1p), jnp.float32).at[:, :fc1].set(b1)
    w2p = jnp.zeros((f1p, f2p), jnp.float32).at[:fc1, :fc2].set(w2)
    b2p = jnp.zeros((1, f2p), jnp.float32).at[:, :fc2].set(b2)
    w3p = jnp.zeros((1, f2p), jnp.float32).at[:, :fc2].set(w3.T)   # row layout
    b3p = b3.astype(jnp.float32)                                    # (1, 1)

    w1s = w1s.astype(jnp.bfloat16)
    w2p = w2p.astype(jnp.bfloat16)
    if action_size > 8:
        w1a = w1a.astype(jnp.bfloat16)
    return (w1s, w1a, b1p, w2p, b2p, w3p, b3p)


def critic_reference(states, actions, params):
    """Pure-JAX f32 reference (unpadded logical params)."""
    w1, b1, w2, b2, w3, b3 = params
    xs = jnp.concatenate([states, actions], axis=1)
    h1 = jnp.maximum(xs @ w1 + b1, 0.0)
    h2 = jnp.maximum(h1 @ w2 + b2, 0.0)
    return h2 @ w3 + b3


def critic_reference_kernel_arith(states, actions, params, state_size):
    """Reference reproducing the kernel's mixed precision (bf16 MXU operands,
    f32 accumulation; actions / fc3 path in f32)."""
    w1, b1, w2, b2, w3, b3 = params
    hp = jax.lax.Precision.HIGHEST
    q16 = lambda x: x.astype(jnp.bfloat16).astype(jnp.float32)
    w1s, w1a = w1[:state_size], w1[state_size:]

    h1 = jnp.dot(q16(states), q16(w1s), precision=hp)
    if actions.shape[1] <= 8:
        h1 = h1 + jnp.dot(actions, w1a, precision=hp)
    else:
        h1 = h1 + jnp.dot(q16(actions), q16(w1a), precision=hp)
    h1 = jnp.maximum(h1 + b1, 0.0)
    h2 = jnp.maximum(jnp.dot(q16(h1), q16(w2), precision=hp) + b2, 0.0)
    return jnp.dot(h2, w3, precision=hp) + b3


if __name__ == "__main__":
    key = jax.random.PRNGKey(0)
    k_s, k_a, k_p = jax.random.split(key, 3)

    # Small shapes consistent with the module (Tennis-like critic).
    # B=37 deliberately exercises batch padding and a multi-step grid.
    B, state_size, action_size, fc1, fc2 = 37, 24, 2, 64, 32

    states = jax.random.normal(k_s, (B, state_size), jnp.float32)
    actions = jax.random.normal(k_a, (B, action_size), jnp.float32)

    logical_params = init_critic_params(k_p, state_size, action_size, fc1, fc2)
    kernel_params = prepare_kernel_params(logical_params, state_size, action_size)

    q = critic_forward(states, actions, kernel_params)
    q = jax.block_until_ready(q)

    q_ref = critic_reference_kernel_arith(states, actions, logical_params, state_size)
    assert q.shape == (B, 1)
    assert jnp.allclose(q, q_ref, atol=1e-4, rtol=1e-3), "mismatch vs reference"

    print("KERNEL_OK")
</pallas_src>

<mosaic_0001>
module attributes {stable_mosaic.version = 11 : i64} {
  func.func @critic_kernel(%arg0: i32, %arg1: memref<24x24xbf16, #tpu.memory_space<vmem>>, %arg2: memref<24x2xf32, #tpu.memory_space<vmem>>, %arg3: memref<24x128xbf16, #tpu.memory_space<vmem>>, %arg4: memref<2x128xf32, #tpu.memory_space<vmem>>, %arg5: memref<1x128xf32, #tpu.memory_space<vmem>>, %arg6: memref<128x128xbf16, #tpu.memory_space<vmem>>, %arg7: memref<1x128xf32, #tpu.memory_space<vmem>>, %arg8: memref<1x128xf32, #tpu.memory_space<vmem>>, %arg9: memref<1x1xf32, #tpu.memory_space<vmem>>, %arg10: memref<24x1xf32, #tpu.memory_space<vmem>>) attributes {dimension_semantics = [#tpu.dimension_semantics<parallel>], iteration_bounds = array<i64: 2>, scalar_prefetch = 0 : i64, scratch_operands = 0 : i64, tpu.core_type = #tpu.core_type<tc>, window_params = [{transform_indices = @transform_0, window_bounds = array<i64: 24, 24>}, {transform_indices = @transform_1, window_bounds = array<i64: 24, 2>}, {pipeline_mode = #tpu.pipeline_mode<synchronous>, transform_indices = @transform_2, window_bounds = array<i64: 24, 128>}, {pipeline_mode = #tpu.pipeline_mode<synchronous>, transform_indices = @transform_3, window_bounds = array<i64: 2, 128>}, {pipeline_mode = #tpu.pipeline_mode<synchronous>, transform_indices = @transform_4, window_bounds = array<i64: 1, 128>}, {pipeline_mode = #tpu.pipeline_mode<synchronous>, transform_indices = @transform_5, window_bounds = array<i64: 128, 128>}, {pipeline_mode = #tpu.pipeline_mode<synchronous>, transform_indices = @transform_6, window_bounds = array<i64: 1, 128>}, {pipeline_mode = #tpu.pipeline_mode<synchronous>, transform_indices = @transform_7, window_bounds = array<i64: 1, 128>}, {pipeline_mode = #tpu.pipeline_mode<synchronous>, transform_indices = @transform_8, window_bounds = array<i64: 1, 1>}, {transform_indices = @transform_9, window_bounds = array<i64: 24, 1>}]} {
    %c0 = arith.constant 0 : index
    %c0_0 = arith.constant 0 : index
    %0 = vector.load %arg1[%c0, %c0_0] : memref<24x24xbf16, #tpu.memory_space<vmem>>, vector<24x24xbf16>
    %c0_1 = arith.constant 0 : index
    %c0_2 = arith.constant 0 : index
    %1 = vector.load %arg3[%c0_1, %c0_2] : memref<24x128xbf16, #tpu.memory_space<vmem>>, vector<24x128xbf16>
    %cst = arith.constant dense<0.000000e+00> : vector<24x128xf32>
    %2 = tpu.matmul %0, %1, %cst {dimension_numbers = #tpu.dot_dimension_numbers<[1], [0], [0], [1], [0, 0, 1, 1], [], []>} : vector<24x24xbf16>, vector<24x128xbf16>, vector<24x128xf32> -> vector<24x128xf32>
    %c0_3 = arith.constant 0 : index
    %c0_4 = arith.constant 0 : index
    %3 = vector.load %arg2[%c0_3, %c0_4] : memref<24x2xf32, #tpu.memory_space<vmem>>, vector<24x2xf32>
    %c0_5 = arith.constant 0 : index
    %c0_6 = arith.constant 0 : index
    %4 = vector.load %arg4[%c0_5, %c0_6] : memref<2x128xf32, #tpu.memory_space<vmem>>, vector<2x128xf32>
    %5 = vector.extract_strided_slice %3 {offsets = [0, 0], sizes = [24, 1], strides = [1, 1]} : vector<24x2xf32> to vector<24x1xf32>
    %6 = vector.extract_strided_slice %4 {offsets = [0, 0], sizes = [1, 128], strides = [1, 1]} : vector<2x128xf32> to vector<1x128xf32>
    %7 = vector.broadcast %5 : vector<24x1xf32> to vector<24x128xf32>
    %8 = vector.broadcast %6 : vector<1x128xf32> to vector<24x128xf32>
    %9 = arith.mulf %7, %8 : vector<24x128xf32>
    %10 = arith.addf %2, %9 : vector<24x128xf32>
    %11 = vector.extract_strided_slice %3 {offsets = [0, 1], sizes = [24, 1], strides = [1, 1]} : vector<24x2xf32> to vector<24x1xf32>
    %12 = vector.extract_strided_slice %4 {offsets = [1, 0], sizes = [1, 128], strides = [1, 1]} : vector<2x128xf32> to vector<1x128xf32>
    %13 = vector.broadcast %11 : vector<24x1xf32> to vector<24x128xf32>
    %14 = vector.broadcast %12 : vector<1x128xf32> to vector<24x128xf32>
    %15 = arith.mulf %13, %14 : vector<24x128xf32>
    %16 = arith.addf %10, %15 : vector<24x128xf32>
    %c0_7 = arith.constant 0 : index
    %c0_8 = arith.constant 0 : index
    %17 = vector.load %arg5[%c0_7, %c0_8] : memref<1x128xf32, #tpu.memory_space<vmem>>, vector<1x128xf32>
    %18 = vector.broadcast %17 : vector<1x128xf32> to vector<24x128xf32>
    %19 = arith.addf %16, %18 : vector<24x128xf32>
    %cst_9 = arith.constant 0.000000e+00 : f32
    %20 = vector.broadcast %cst_9 : f32 to vector<24x128xf32>
    %21 = arith.maximumf %19, %20 : vector<24x128xf32>
    %22 = arith.truncf %21 : vector<24x128xf32> to vector<24x128xbf16>
    %c0_10 = arith.constant 0 : index
    %c0_11 = arith.constant 0 : index
    %23 = vector.load %arg6[%c0_10, %c0_11] : memref<128x128xbf16, #tpu.memory_space<vmem>>, vector<128x128xbf16>
    %cst_12 = arith.constant dense<0.000000e+00> : vector<24x128xf32>
    %24 = tpu.matmul %22, %23, %cst_12 {dimension_numbers = #tpu.dot_dimension_numbers<[1], [0], [0], [1], [0, 0, 1, 1], [], []>} : vector<24x128xbf16>, vector<128x128xbf16>, vector<24x128xf32> -> vector<24x128xf32>
    %c0_13 = arith.constant 0 : index
    %c0_14 = arith.constant 0 : index
    %25 = vector.load %arg7[%c0_13, %c0_14] : memref<1x128xf32, #tpu.memory_space<vmem>>, vector<1x128xf32>
    %26 = vector.broadcast %25 : vector<1x128xf32> to vector<24x128xf32>
    %27 = arith.addf %24, %26 : vector<24x128xf32>
    %cst_15 = arith.constant 0.000000e+00 : f32
    %28 = vector.broadcast %cst_15 : f32 to vector<24x128xf32>
    %29 = arith.maximumf %27, %28 : vector<24x128xf32>
    %c0_16 = arith.constant 0 : index
    %c0_17 = arith.constant 0 : index
    %30 = vector.load %arg8[%c0_16, %c0_17] : memref<1x128xf32, #tpu.memory_space<vmem>>, vector<1x128xf32>
    %31 = vector.broadcast %30 : vector<1x128xf32> to vector<24x128xf32>
    %32 = arith.mulf %29, %31 : vector<24x128xf32>
    %cst_18 = arith.constant dense<0.000000e+00> : vector<24xf32>
    %33 = vector.multi_reduction <add>, %32, %cst_18 [1] : vector<24x128xf32> to vector<24xf32>
    %34 = vector.shape_cast %33 : vector<24xf32> to vector<24x1xf32>
    %c0_19 = arith.constant 0 : index
    %c0_20 = arith.constant 0 : index
    %35 = vector.load %arg9[%c0_19, %c0_20] : memref<1x1xf32, #tpu.memory_space<vmem>>, vector<1x1xf32>
    %36 = vector.broadcast %35 : vector<1x1xf32> to vector<24x1xf32>
    %37 = arith.addf %34, %36 : vector<24x1xf32>
    %c0_21 = arith.constant 0 : index
    %c0_22 = arith.constant 0 : index
    %38 = vector.load %arg10[%c0_21, %c0_22] : memref<24x1xf32, #tpu.memory_space<vmem>>, vector<24x1xf32>
    tpu.vector_store %arg10[%c0_21, %c0_22], %37 {strides = array<i32>} : memref<24x1xf32, #tpu.memory_space<vmem>>, vector<24x1xf32>,
    return
  }
  func.func @transform_0(%arg0: i32) -> (i32, i32) {
    %c0_i32 = arith.constant 0 : i32
    %c0_i32_0 = arith.constant 0 : i32
    return %arg0, %c0_i32 : i32, i32
  }
  func.func @transform_1(%arg0: i32) -> (i32, i32) {
    %c0_i32 = arith.constant 0 : i32
    %c0_i32_0 = arith.constant 0 : i32
    return %arg0, %c0_i32 : i32, i32
  }
  func.func @transform_2(%arg0: i32) -> (i32, i32) {
    %c0_i32 = arith.constant 0 : i32
    %c0_i32_0 = arith.constant 0 : i32
    %c0_i32_1 = arith.constant 0 : i32
    return %c0_i32, %c0_i32_0 : i32, i32
  }
  func.func @transform_3(%arg0: i32) -> (i32, i32) {
    %c0_i32 = arith.constant 0 : i32
    %c0_i32_0 = arith.constant 0 : i32
    %c0_i32_1 = arith.constant 0 : i32
    return %c0_i32, %c0_i32_0 : i32, i32
  }
  func.func @transform_4(%arg0: i32) -> (i32, i32) {
    %c0_i32 = arith.constant 0 : i32
    %c0_i32_0 = arith.constant 0 : i32
    %c0_i32_1 = arith.constant 0 : i32
    return %c0_i32, %c0_i32_0 : i32, i32
  }
  func.func @transform_5(%arg0: i32) -> (i32, i32) {
    %c0_i32 = arith.constant 0 : i32
    %c0_i32_0 = arith.constant 0 : i32
    %c0_i32_1 = arith.constant 0 : i32
    return %c0_i32, %c0_i32_0 : i32, i32
  }
  func.func @transform_6(%arg0: i32) -> (i32, i32) {
    %c0_i32 = arith.constant 0 : i32
    %c0_i32_0 = arith.constant 0 : i32
    %c0_i32_1 = arith.constant 0 : i32
    return %c0_i32, %c0_i32_0 : i32, i32
  }
  func.func @transform_7(%arg0: i32) -> (i32, i32) {
    %c0_i32 = arith.constant 0 : i32
    %c0_i32_0 = arith.constant 0 : i32
    %c0_i32_1 = arith.constant 0 : i32
    return %c0_i32, %c0_i32_0 : i32, i32
  }
  func.func @transform_8(%arg0: i32) -> (i32, i32) {
    %c0_i32 = arith.constant 0 : i32
    %c0_i32_0 = arith.constant 0 : i32
    %c0_i32_1 = arith.constant 0 : i32
    return %c0_i32, %c0_i32_0 : i32, i32
  }
  func.func @transform_9(%arg0: i32) -> (i32, i32) {
    %c0_i32 = arith.constant 0 : i32
    %c0_i32_0 = arith.constant 0 : i32
    return %arg0, %c0_i32 : i32, i32
  }
}

</mosaic_0001>

<bundles_post_ra>
// kernel: tpu_custom_call.1
= control target key start
LH: loop header
LB: loop body
LE: loop exit
PB: predicated region body
PF: predicated region fallthrough
CT: control target
= control target key end

     0   :  { %s800_s11 = smov 0   ;;  %s870_s0 = inlined_call_operand.vmem [shape: bf16[48,24], index: 0, kind: input, shape index: {}]   ;;  %s871_s1 = inlined_call_operand.vmem [shape: f32[48,2], index: 1, kind: input, shape index: {}]   ;;  %s872_s2 = inlined_call_operand.vmem [shape: bf16[24,128], index: 2, kind: input, shape index: {}]   ;;  %s873_s3 = inlined_call_operand.vmem [shape: f32[2,128], index: 3, kind: input, shape index: {}]   ;;  %s874_s4 = inlined_call_operand.vmem [shape: f32[1,128], index: 4, kind: input, shape index: {}]   ;;  %s875_s5 = inlined_call_operand.vmem [shape: bf16[128,128], index: 5, kind: input, shape index: {}]   ;;  %s876_s6 = inlined_call_operand.vmem [shape: f32[1,128], index: 6, kind: input, shape index: {}]   ;;  %s877_s7 = inlined_call_operand.vmem [shape: f32[1,128], index: 7, kind: input, shape index: {}]   ;;  %s878_s8 = inlined_call_operand.<no memory space> [shape: f32[1,1], index: 8, kind: input, shape index: {}]   ;;  %s879_s9 = inlined_call_operand.vmem [shape: f32[48,1], index: 9, kind: output, shape index: {}]  }
   0x1   :  { %v14_v0 = vstv %s878_s8 }
   0x2   :  { %15 = vst [vmem:[#allocation2] sm:$0x1] %v14_v0 }
   0x3 LB: > { %s648_s12 = sadd.s32 4294967295, %s743_s11   ;;  %p652_p0 = scmp.ge.s32.totalorder %s743_s11, 1  ;;  %s743_s11 = sphi %s800_s11, %s21_s11  }
   0x4   : > { %p301_p1 = scmp.lt.s32.totalorder %s743_s11, 3 }
   0x6   : > { %p302_p2 = pnand %p652_p0, %p301_p1 }
   0x7   : > { %s342_s8 = smul.u32 (!%p302_p2), 3, %s648_s12 }
   0x8   : > { %305 = sbr.rel (%p302_p2) target bundleno = 435 (0x1b3), region = 56 }
   0x9   : > { %p343_p3 = scmp.lt.s32.totalorder (!%p302_p2), %s342_s8, 5 }
   0xd   : > { %v366_v1 = vld [vmem:[%s872_s2 + $0x8] sm:$0xf]  ;;  %vm414_vm0 = vcmask 1043456   ;;  %v709_v3 = vld [vmem:[%s875_s5 + $0x38] sm:$0xff]  ;;  %v745_v4 = vmov 0   ;;  %v746_v6 = vmov 1  }
   0xe   : > { %v403_v2 = vunpack.c.l.b16 %v366_v1  ;;  %729 = vset.pattern.permute.xlu1 %v745_v4  ;;  %728 = vset.pattern.permute.xlu0 %v745_v4  ;;  %v708_v7 = vld [vmem:[%s875_s5 + $0x30] sm:$0xff]  ;;  %s881_s8 = smov (!%p343_p3, %s342_s8), 5  ;;  %v701_v9 = vld [vmem:[%s872_s2] sm:$0xff]  ;;  %vm407_vm1 = vcmask 195584   ;;  %v707_v17 = vld [vmem:[%s875_s5 + $0x28] sm:$0xff]  ;;  %vm576_vm2 = vcmask 7168  }
   0xf   : > { %731 = vset.pattern.permute.xlu2 %v746_v6  ;;  %535 = vmatpush.bf16.msra.mxu1 %v709_v3  ;;  %s653_s21 = sshll.u32 %s881_s8, 2  ;;  %s654_s22 = sshll.u32 %s881_s8, 3  ;;  %v706_v18 = vld [vmem:[%s875_s5 + $0x20] sm:$0xff]  ;;  %v705_v19 = vld [vmem:[%s875_s5 + $0x18] sm:$0xff]  ;;  %v704_v20 = vld [vmem:[%s875_s5 + $0x10] sm:$0xff] }
  0x10   : > { %v405_v5 = vpack.c.b16 %v403_v2, %v403_v2  ;;  %710 = vmatpush.bf16.msra.mxu2 %v709_v3  ;;  %s346_s25 = scalar_lea.vmem %s870_s0, %s653_s21  ;;  %s352_s28 = scalar_lea.vmem %s871_s1, %s654_s22  ;;  %v703_v21 = vld [vmem:[%s875_s5 + $0x8] sm:$0xff]  ;;  %v702_v22 = vld [vmem:[%s875_s5] sm:$0xff] }
  0x11   : > { %v369_v10 = vld [vmem:[%s352_s28 + $0x10] sm:$0xff]  ;;  %v367_v11 = vld [vmem:[%s352_s28] sm:$0xff]  ;;  %v368_v13 = vld [vmem:[%s352_s28 + $0x8] sm:$0xff]  ;;  %s358_s12 = scalar_lea.vmem %s879_s9, %s654_s22 }
  0x12   : > { %v416_v8 = vsel %vm414_vm0, %v405_v5, 0  ;;  %v700_v12 = vld [vmem:[%s346_s25] sm:$0xff]  ;;  %383 = vperm.xlu1 %729, %v369_v10   ;;  %373 = vperm.xlu0 %728, %v367_v11   ;;  %v363_v14 = vld [vmem:[%s346_s25 + $0x8] sm:$0xf] }
  0x13   : > { %424 = vmatpush.bf16.msra.mxu0 %v416_v8  ;;  %536 = vmatpush.bf16.msra.mxu1 %v708_v7  ;;  %v395_v15 = vunpack.c.l.b16 %v363_v14  ;;  %v370_v24 = vld [vmem:[%s873_s3] sm:$0x3] }
  0x14   : > { %711 = vmatpush.bf16.msra.mxu2 %v708_v7  ;;  %441 = vperm.xlu2 %731, %v368_v13   ;;  %v386_v26 = vperm.slane %v370_v24, 0  ;;  %v448_v28 = vperm.slane %v370_v24, 1  ;;  %v733_v38 = vld [vmem:[%s874_s4] ss:$0 sm:$0xff] }
  0x15   : > { %v397_v16 = vpack.c.b16 %v395_v15, %v395_v15  ;;  %v734_v57 = vld [vmem:[%s876_s6] ss:$0 sm:$0xff] }
  0x16   : > { %v735_v60 = vld [vmem:[%s877_s7] ss:$0 sm:$0xff] }
  0x17   : > { %425 = vmatpush.bf16.msra.mxu0 %v701_v9  ;;  %537 = vmatpush.bf16.msra.mxu1 %v707_v17  ;;  %v736_v8 = vld [vmem:[#allocation2] ss:$0 sm:$0xff] }
  0x18   : > { %712 = vmatpush.bf16.msra.mxu2 %v707_v17 }
  0x1a   : > { %664 = vmatmul.msk.bf16.vlgmr.msra.gmra.mxu0 %vm407_vm1, %v700_v12  ;;  %730 = vset.pattern.permute.xlu1 %v746_v6 }
  0x1b   : > { %378 = vperm.xlu0 %728, %v368_v13   ;;  %437 = vperm.xlu1 %730, %v367_v11  }
  0x1c   : > { %445 = vperm.xlu2 %731, %v369_v10   ;;  %538 = vmatpush.bf16.msra.mxu1 %v706_v18 }
  0x1d   : > { %713 = vmatpush.bf16.msra.mxu2 %v706_v18 }
  0x20   : > { %539 = vmatpush.bf16.msra.mxu1 %v705_v19 }
  0x21   : > { %714 = vmatpush.bf16.msra.mxu2 %v705_v19 }
  0x23   : > { %732 = vset.pattern.permute.xlu0 %v746_v6 }
  0x24   : > { %540 = vmatpush.bf16.msra.mxu1 %v704_v20 }
  0x25   : > { %715 = vmatpush.bf16.msra.mxu2 %v704_v20 }
  0x28   : > { %541 = vmatpush.bf16.msra.mxu1 %v703_v21 }
  0x29   : > { %716 = vmatpush.bf16.msra.mxu2 %v703_v21 }
  0x2a   : > { %665 = vmatmul.msk.bf16.gmra.mxu0 %vm407_vm1, %v397_v16 }
  0x2c   : > { %542 = vmatpush.bf16.msra.mxu1 %v702_v22 }
  0x2d   : > { %717 = vmatpush.bf16.msra.mxu2 %v702_v22 }
  0x6e   : > { %v442_v33 = vpop.permute.xlu2 %441 }
  0x6f   : > { %v450_v35 = vmul.f32 %v448_v28, %v442_v33 }
  0x76   : > { %v446_v44 = vpop.permute.xlu2 %445 }
  0x77   : > { %v451_v49 = vmul.f32 %v448_v28, %v446_v44 }
  0x84   : > { %v384_v23 = vpop.permute.xlu1 %383  ;;  %v374_v25 = vpop.permute.xlu0 %373 }
  0x85   : > { %v387_v27 = vmul.f32 %v386_v26, %v374_v25  ;;  %v389_v45 = vmul.f32 %v386_v26, %v384_v23 }
  0x8d   : > { %v438_v29 = vpop.permute.xlu1 %437  ;;  %v379_v34 = vpop.permute.xlu0 %378 }
  0x8e   : > { %v449_v31 = vmul.f32 %v448_v28, %v438_v29  ;;  %v388_v37 = vmul.f32 %v386_v26, %v379_v34 }
  0x97   : > { %v427_v30 = vpop.f32.mrf.mxu0 }
  0x98   : > { %v428_v32 = vadd.f32 %v427_v30, %v387_v27 }
  0x9a   : > { %v452_v36 = vadd.f32 %v449_v31, %v428_v32 }
  0x9c   : > { %v459_v42 = vadd.f32 %v733_v38, %v452_v36 }
  0x9e   : > { %v462_v46 = vmax.f32 %v459_v42, 0.0 }
  0x9f   : > { %v429_v39 = vpop.f32.mrf.mxu0 }
  0xa0   : > { %v430_v40 = vadd.f32 %v429_v39, %v388_v37 }
  0xa2   : > { %v453_v41 = vadd.f32 %v450_v35, %v430_v40 }
  0xa4   : > { %v460_v43 = vadd.f32 %v733_v38, %v453_v41 }
  0xa6   : > { %v463_v47 = vmax.f32 %v460_v43, 0.0 }
  0xa7   : > { %v432_v48 = vpop.f32.mrf.mxu0 }
  0xa8   : > { %v433_v50 = vadd.f32 %v432_v48, %v389_v45  ;;  %v465_v51 = vpack.c.bf16 %v463_v47, %v462_v46 }
  0xaa   : > { %v454_v52 = vadd.f32 %v451_v49, %v433_v50  ;;  %543 = vmatmul.bf16.vlgmr.msra.gmra.mxu1 %v465_v51 }
  0xac   : > { %v461_v53 = vadd.f32 %v733_v38, %v454_v52 }
  0xae   : > { %v464_v54 = vmax.f32 %v461_v53, 0.0 }
  0xaf   : > { %v434_v55 = vpop.f32.mrf.mxu0 }
  0xb0   : > { %v466_v56 = vpack.c.bf16 %v464_v54, %v464_v54 }
  0xb2   : > { %548 = vmatmul.bf16.vlgmr.msra.gmra.mxu2 %v466_v56 }
 0x127   : > { %v544_v58 = vpop.f32.mrf.mxu1 }
 0x128   : > { %v545_v59 = vadd.f32 %v734_v57, %v544_v58 }
 0x12a   : > { %v553_v61 = vmax.f32 %v545_v59, 0.0 }
 0x12c   : > { %v560_v62 = vmul.f32 %v735_v60, %v553_v61 }
 0x12e   : > { %563 = vadd.xlane.f32.xlu0 %v560_v62 }
 0x12f   : > { %v546_v63 = vpop.f32.mrf.mxu1 }
 0x130   : > { %v547_v0 = vadd.f32 %v734_v57, %v546_v63 }
 0x132   : > { %v554_v1 = vmax.f32 %v547_v0, 0.0 }
 0x134   : > { %v561_v2 = vmul.f32 %v735_v60, %v554_v1 }
 0x135   : > { %v549_v3 = vpop.f32.mrf.mxu2 }
 0x136   : > { %v550_v4 = vadd.f32 %v734_v57, %v549_v3  ;;  %565 = vadd.xlane.f32.xlu1 %v561_v2 }
 0x138   : > { %v555_v5 = vmax.f32 %v550_v4, 0.0 }
 0x13a   : > { %v562_v6 = vmul.f32 %v735_v60, %v555_v5 }
 0x13c   : > { %567 = vadd.xlane.f32.xlu2 %v562_v6 }
 0x13d   : > { %v551_v7 = vpop.f32.mrf.mxu2 }
 0x1a1   : > { %v564_v9 = vpop.xlane.xlu0 %563 }
 0x1a2   : > { %v573_v10 = vadd.f32 %v736_v8, %v564_v9 }
 0x1a4   : > { %577 = vst.msk [vmem:[%s358_s12] sm:$0xff] %vm576_vm2, %v573_v10 }
 0x1a9   : > { %v566_v11 = vpop.xlane.xlu1 %565 }
 0x1aa   : > { %v574_v12 = vadd.f32 %v736_v8, %v566_v11 }
 0x1ac   : > { %578 = vst.msk [vmem:[%s358_s12 + $0x8] sm:$0xff] %vm576_vm2, %v574_v12 }
 0x1af   : > { %v568_v13 = vpop.xlane.xlu2 %567 }
 0x1b0   : > { %v575_v14 = vadd.f32 %v736_v8, %v568_v13 }
 0x1b2   : > { %579 = vst.msk [vmem:[%s358_s12 + $0x10] sm:$0xff] %vm576_vm2, %v575_v14 }
 0x1b3 PF: > { %s21_s11 = sadd.s32 1, %s743_s11  }
 0x1b4   : > { %p18_p4 = scmp.ge.s32.totalorder %s21_s11, 4  }
 0x1b6   :  { %20 = sbr.rel (!%p18_p4) target bundleno = 3 (0x3), region = 89 }

</bundles_post_ra>
